<compile_context>
chip_gen: v7x
topology: tpu7x:2x2x1
jax: 0.10.0
libtpu: 0.0.40
codegen_flags: <defaults>
</compile_context>

<pallas_src>
import jax
import jax.numpy as jnp
import numpy as np
from jax.experimental import pallas as pl
from jax.experimental.pallas import tpu as pltpu


def _se_kernel(state_ref, x_ref, w1_ref, b1_ref, w2_ref, b2_ref, out_ref):
    # state_ref : (TB, HWs, C)   x_ref/out_ref : (TB, HWx, C)   (channels-last)
    # w1_ref    : (C, hidden)    b1_ref : (1, hidden)
    # w2_ref    : (hidden, 2C)   b2_ref : (1, 2C)
    C = state_ref.shape[-1]

    # AdaptiveAvgPool2d(1): global mean over the (flattened) spatial axis.
    # Accumulate in f32 even if the inputs are bf16.
    pooled = jnp.mean(state_ref[...].astype(jnp.float32), axis=1)          # (TB, C)

    # Linear(C, hidden) + ReLU, then Linear(hidden, 2C); M = TB.
    h = jnp.dot(pooled, w1_ref[...], preferred_element_type=jnp.float32) + b1_ref[...]
    h = jnp.maximum(h, 0.0)
    wb = jnp.dot(h, w2_ref[...], preferred_element_type=jnp.float32) + b2_ref[...]  # (TB, 2C)

    # split(channels, dim=1): first C -> gate (sigmoid), second C -> bias.
    z = jax.nn.sigmoid(wb[:, :C])                                          # (TB, C)
    b = wb[:, C:]                                                          # (TB, C)

    # C stays on lanes; broadcasting (TB, 1, C) over HW is a sublane broadcast.
    out_ref[...] = (x_ref[...].astype(jnp.float32) * z[:, None, :]
                    + b[:, None, :]).astype(out_ref.dtype)


def _choose_batch_tile(n, hw_s, hw_x, c, itemsize, target_bytes=4 << 20):
    """Images per grid step: big enough DMAs, >=2 grid steps, divides N."""
    per_image = (hw_s + 2 * hw_x) * c * itemsize          # state + x + out
    tb = max(1, target_bytes // per_image)
    tb = min(tb, n)
    if n >= 2:                                            # keep >=2 grid steps (v7x: 2 TCs)
        tb = min(tb, max(1, n // 2))
    while n % tb != 0:                                    # avoid padded blocks
        tb -= 1
    return int(tb)


def squeeze_and_excite_channels_last(state_cl, x_cl, w1, b1, w2, b2):
    """Core kernel. state_cl: (N, HWs, C), x_cl: (N, HWx, C) -> (N, HWx, C)."""
    N, HWs, C = state_cl.shape
    _, HWx, _ = x_cl.shape
    hidden = w1.shape[1]
    two_c = w2.shape[1]
    itemsize = jnp.dtype(x_cl.dtype).itemsize

    TB = _choose_batch_tile(N, HWs, HWx, C, itemsize)
    grid = (N // TB,)

    # Double-buffered tiles + f32 temporaries + weights, capped well below
    # v7x's 64 MiB physical VMEM; floor lifts v5e's 16 MiB default.
    tile_bytes = TB * (HWs + 2 * HWx) * C * itemsize
    vmem_limit = int(min(48 << 20, max(16 << 20, 4 * tile_bytes + (2 << 20))))

    flops = (N * HWs * C                       # pooling adds
             + 2 * N * HWx * C                 # apply: mul + add
             + 2 * N * C * hidden              # FC1
             + 2 * N * hidden * two_c)         # FC2
    bytes_accessed = ((N * HWs * C + 2 * N * HWx * C) * itemsize
                      + (w1.size + b1.size + w2.size + b2.size)
                      * jnp.dtype(w1.dtype).itemsize)

    return pl.pallas_call(
        _se_kernel,
        out_shape=jax.ShapeDtypeStruct((N, HWx, C), x_cl.dtype),
        grid=grid,
        in_specs=[
            pl.BlockSpec((TB, HWs, C), lambda i: (i, 0, 0)),
            pl.BlockSpec((TB, HWx, C), lambda i: (i, 0, 0)),
            pl.BlockSpec((C, hidden), lambda i: (0, 0)),      # weights resident
            pl.BlockSpec((1, hidden), lambda i: (0, 0)),
            pl.BlockSpec((hidden, two_c), lambda i: (0, 0)),
            pl.BlockSpec((1, two_c), lambda i: (0, 0)),
        ],
        out_specs=pl.BlockSpec((TB, HWx, C), lambda i: (i, 0, 0)),
        compiler_params=pltpu.CompilerParams(
            dimension_semantics=("parallel",),
            vmem_limit_bytes=vmem_limit,
        ),
        cost_estimate=pl.CostEstimate(
            flops=int(flops),
            transcendentals=int(N * C),
            bytes_accessed=int(bytes_accessed),
        ),
    )(state_cl, x_cl, w1, b1, w2, b2)


def squeeze_and_excite(state, x, w1, b1, w2, b2):
    """API-compatible with the PyTorch module: NCHW in, NCHW out.

    In a real channels-last pipeline the transposes below disappear; they are
    plain XLA ops outside the kernel.
    """
    N, C, Hs, Ws = state.shape
    _, _, Hi, Wi = x.shape
    state_cl = jnp.transpose(state, (0, 2, 3, 1)).reshape(N, Hs * Ws, C)
    x_cl = jnp.transpose(x, (0, 2, 3, 1)).reshape(N, Hi * Wi, C)
    out_cl = squeeze_and_excite_channels_last(state_cl, x_cl, w1, b1, w2, b2)
    return jnp.transpose(out_cl.reshape(N, Hi, Wi, C), (0, 3, 1, 2))


def init_params(key, channels, squeeze_rate):
    """Deterministic nn.Linear-style init (U[-1/sqrt(fan_in), 1/sqrt(fan_in)])."""
    hidden = int(channels // squeeze_rate)
    k1, k2, k3, k4 = jax.random.split(key, 4)
    lim1 = 1.0 / np.sqrt(channels)
    lim2 = 1.0 / np.sqrt(hidden)
    w1 = jax.random.uniform(k1, (channels, hidden), jnp.float32, -lim1, lim1)
    b1 = jax.random.uniform(k2, (1, hidden), jnp.float32, -lim1, lim1)
    w2 = jax.random.uniform(k3, (hidden, 2 * channels), jnp.float32, -lim2, lim2)
    b2 = jax.random.uniform(k4, (1, 2 * channels), jnp.float32, -lim2, lim2)
    return w1, b1, w2, b2


def reference(state, x, w1, b1, w2, b2):
    C = state.shape[1]
    pooled = jnp.mean(state, axis=(2, 3))                       # (N, C)
    h = jnp.maximum(pooled @ w1 + b1, 0.0)                      # (N, hidden)
    wb = h @ w2 + b2                                            # (N, 2C)
    w, b = wb[:, :C], wb[:, C:]
    z = jax.nn.sigmoid(w)
    return x * z[:, :, None, None] + b[:, :, None, None]


def _run_case(key, N, channels, squeeze_rate, H, W):
    k_state, k_x, k_params = jax.random.split(key, 3)
    state = jax.random.normal(k_state, (N, channels, H, W), jnp.float32)
    x = jax.random.normal(k_x, (N, channels, H, W), jnp.float32)
    w1, b1, w2, b2 = init_params(k_params, channels, squeeze_rate)

    out = jax.jit(squeeze_and_excite)(state, x, w1, b1, w2, b2)
    out = jax.block_until_ready(out)

    ref = reference(state, x, w1, b1, w2, b2)
    np.testing.assert_allclose(np.asarray(out), np.asarray(ref),
                               rtol=1e-4, atol=1e-4)


if __name__ == "__main__":
    key = jax.random.PRNGKey(0)
    k_small, k_big = jax.random.split(key)

    # Tiny module-sized case (matches the original spec's scale).
    _run_case(k_small, N=2, channels=4, squeeze_rate=2, H=16, W=16)

    # Lane-dense case (C = 128 on lanes) exercising the optimized layout
    # and multi-image grid steps.
    _run_case(k_big, N=4, channels=128, squeeze_rate=4, H=16, W=16)

    print("KERNEL_OK")
</pallas_src>

<mosaic_0001>
module attributes {stable_mosaic.version = 11 : i64} {
  func.func @_se_kernel(%arg0: i32, %arg1: memref<1x256x4xf32, #tpu.memory_space<vmem>>, %arg2: memref<1x256x4xf32, #tpu.memory_space<vmem>>, %arg3: memref<4x2xf32, #tpu.memory_space<vmem>>, %arg4: memref<1x2xf32, #tpu.memory_space<vmem>>, %arg5: memref<2x8xf32, #tpu.memory_space<vmem>>, %arg6: memref<1x8xf32, #tpu.memory_space<vmem>>, %arg7: memref<1x256x4xf32, #tpu.memory_space<vmem>>) attributes {dimension_semantics = [#tpu.dimension_semantics<parallel>], iteration_bounds = array<i64: 2>, scalar_prefetch = 0 : i64, scratch_operands = 0 : i64, tpu.core_type = #tpu.core_type<tc>, window_params = [{transform_indices = @transform_0, window_bounds = array<i64: 1, 256, 4>}, {transform_indices = @transform_1, window_bounds = array<i64: 1, 256, 4>}, {pipeline_mode = #tpu.pipeline_mode<synchronous>, transform_indices = @transform_2, window_bounds = array<i64: 4, 2>}, {pipeline_mode = #tpu.pipeline_mode<synchronous>, transform_indices = @transform_3, window_bounds = array<i64: 1, 2>}, {pipeline_mode = #tpu.pipeline_mode<synchronous>, transform_indices = @transform_4, window_bounds = array<i64: 2, 8>}, {pipeline_mode = #tpu.pipeline_mode<synchronous>, transform_indices = @transform_5, window_bounds = array<i64: 1, 8>}, {transform_indices = @transform_6, window_bounds = array<i64: 1, 256, 4>}]} {
    %c0 = arith.constant 0 : index
    %c0_0 = arith.constant 0 : index
    %c0_1 = arith.constant 0 : index
    %0 = vector.load %arg1[%c0, %c0_0, %c0_1] : memref<1x256x4xf32, #tpu.memory_space<vmem>>, vector<1x256x4xf32>
    %cst = arith.constant dense<0.000000e+00> : vector<1x4xf32>
    %1 = vector.multi_reduction <add>, %0, %cst [1] : vector<1x256x4xf32> to vector<1x4xf32>
    %cst_2 = arith.constant 2.560000e+02 : f32
    %2 = vector.broadcast %cst_2 : f32 to vector<1x4xf32>
    %3 = arith.divf %1, %2 : vector<1x4xf32>
    %c0_3 = arith.constant 0 : index
    %c0_4 = arith.constant 0 : index
    %4 = vector.load %arg3[%c0_3, %c0_4] : memref<4x2xf32, #tpu.memory_space<vmem>>, vector<4x2xf32>
    %cst_5 = arith.constant dense<0.000000e+00> : vector<1x2xf32>
    %5 = tpu.matmul %3, %4, %cst_5 {dimension_numbers = #tpu.dot_dimension_numbers<[1], [0], [0], [1], [0, 0, 1, 1], [], []>} : vector<1x4xf32>, vector<4x2xf32>, vector<1x2xf32> -> vector<1x2xf32>
    %c0_6 = arith.constant 0 : index
    %c0_7 = arith.constant 0 : index
    %6 = vector.load %arg4[%c0_6, %c0_7] : memref<1x2xf32, #tpu.memory_space<vmem>>, vector<1x2xf32>
    %7 = arith.addf %5, %6 : vector<1x2xf32>
    %cst_8 = arith.constant 0.000000e+00 : f32
    %8 = vector.broadcast %cst_8 : f32 to vector<1x2xf32>
    %9 = arith.maximumf %7, %8 : vector<1x2xf32>
    %c0_9 = arith.constant 0 : index
    %c0_10 = arith.constant 0 : index
    %10 = vector.load %arg5[%c0_9, %c0_10] : memref<2x8xf32, #tpu.memory_space<vmem>>, vector<2x8xf32>
    %cst_11 = arith.constant dense<0.000000e+00> : vector<1x8xf32>
    %11 = tpu.matmul %9, %10, %cst_11 {dimension_numbers = #tpu.dot_dimension_numbers<[1], [0], [0], [1], [0, 0, 1, 1], [], []>} : vector<1x2xf32>, vector<2x8xf32>, vector<1x8xf32> -> vector<1x8xf32>
    %c0_12 = arith.constant 0 : index
    %c0_13 = arith.constant 0 : index
    %12 = vector.load %arg6[%c0_12, %c0_13] : memref<1x8xf32, #tpu.memory_space<vmem>>, vector<1x8xf32>
    %13 = arith.addf %11, %12 : vector<1x8xf32>
    %14 = vector.extract_strided_slice %13 {offsets = [0, 0], sizes = [1, 4], strides = [1, 1]} : vector<1x8xf32> to vector<1x4xf32>
    %15 = arith.negf %14 : vector<1x4xf32>
    %16 = math.exp %15 : vector<1x4xf32>
    %cst_14 = arith.constant 1.000000e+00 : f32
    %17 = vector.broadcast %cst_14 : f32 to vector<1x4xf32>
    %18 = arith.addf %17, %16 : vector<1x4xf32>
    %19 = arith.divf %17, %18 : vector<1x4xf32>
    %20 = vector.extract_strided_slice %13 {offsets = [0, 4], sizes = [1, 4], strides = [1, 1]} : vector<1x8xf32> to vector<1x4xf32>
    %c0_15 = arith.constant 0 : index
    %c0_16 = arith.constant 0 : index
    %c0_17 = arith.constant 0 : index
    %21 = vector.load %arg2[%c0_15, %c0_16, %c0_17] : memref<1x256x4xf32, #tpu.memory_space<vmem>>, vector<1x256x4xf32>
    %22 = vector.shape_cast %19 : vector<1x4xf32> to vector<1x1x4xf32>
    %23 = vector.broadcast %22 : vector<1x1x4xf32> to vector<1x256x4xf32>
    %24 = arith.mulf %21, %23 : vector<1x256x4xf32>
    %25 = vector.shape_cast %20 : vector<1x4xf32> to vector<1x1x4xf32>
    %26 = vector.broadcast %25 : vector<1x1x4xf32> to vector<1x256x4xf32>
    %27 = arith.addf %24, %26 : vector<1x256x4xf32>
    %c0_18 = arith.constant 0 : index
    %c0_19 = arith.constant 0 : index
    %c0_20 = arith.constant 0 : index
    %28 = vector.load %arg7[%c0_18, %c0_19, %c0_20] : memref<1x256x4xf32, #tpu.memory_space<vmem>>, vector<1x256x4xf32>
    tpu.vector_store %arg7[%c0_18, %c0_19, %c0_20], %27 {strides = array<i32>} : memref<1x256x4xf32, #tpu.memory_space<vmem>>, vector<1x256x4xf32>,
    return
  }
  func.func @transform_0(%arg0: i32) -> (i32, i32, i32) {
    %c0_i32 = arith.constant 0 : i32
    %c0_i32_0 = arith.constant 0 : i32
    %c0_i32_1 = arith.constant 0 : i32
    return %arg0, %c0_i32, %c0_i32_0 : i32, i32, i32
  }
  func.func @transform_1(%arg0: i32) -> (i32, i32, i32) {
    %c0_i32 = arith.constant 0 : i32
    %c0_i32_0 = arith.constant 0 : i32
    %c0_i32_1 = arith.constant 0 : i32
    return %arg0, %c0_i32, %c0_i32_0 : i32, i32, i32
  }
  func.func @transform_2(%arg0: i32) -> (i32, i32) {
    %c0_i32 = arith.constant 0 : i32
    %c0_i32_0 = arith.constant 0 : i32
    %c0_i32_1 = arith.constant 0 : i32
    return %c0_i32, %c0_i32_0 : i32, i32
  }
  func.func @transform_3(%arg0: i32) -> (i32, i32) {
    %c0_i32 = arith.constant 0 : i32
    %c0_i32_0 = arith.constant 0 : i32
    %c0_i32_1 = arith.constant 0 : i32
    return %c0_i32, %c0_i32_0 : i32, i32
  }
  func.func @transform_4(%arg0: i32) -> (i32, i32) {
    %c0_i32 = arith.constant 0 : i32
    %c0_i32_0 = arith.constant 0 : i32
    %c0_i32_1 = arith.constant 0 : i32
    return %c0_i32, %c0_i32_0 : i32, i32
  }
  func.func @transform_5(%arg0: i32) -> (i32, i32) {
    %c0_i32 = arith.constant 0 : i32
    %c0_i32_0 = arith.constant 0 : i32
    %c0_i32_1 = arith.constant 0 : i32
    return %c0_i32, %c0_i32_0 : i32, i32
  }
  func.func @transform_6(%arg0: i32) -> (i32, i32, i32) {
    %c0_i32 = arith.constant 0 : i32
    %c0_i32_0 = arith.constant 0 : i32
    %c0_i32_1 = arith.constant 0 : i32
    return %arg0, %c0_i32, %c0_i32_0 : i32, i32, i32
  }
}

</mosaic_0001>

<bundles_post_ra>
// kernel: squeeze_and_excite.1
= control target key start
LH: loop header
LB: loop body
LE: loop exit
PB: predicated region body
PF: predicated region fallthrough
CT: control target
= control target key end

     0   :  { %s845_s21 = smov 0   ;;  %s1049_s0 = inlined_call_operand.vmem [shape: f32[2,256,4], index: 0, kind: input, shape index: {}]   ;;  %s1050_s1 = inlined_call_operand.vmem [shape: f32[2,256,4], index: 1, kind: input, shape index: {}]   ;;  %s1051_s2 = inlined_call_operand.vmem [shape: f32[4,2], index: 2, kind: input, shape index: {}]   ;;  %s1052_s3 = inlined_call_operand.vmem [shape: f32[1,2], index: 3, kind: input, shape index: {}]   ;;  %s1053_s4 = inlined_call_operand.vmem [shape: f32[2,8], index: 4, kind: input, shape index: {}]   ;;  %s1054_s5 = inlined_call_operand.vmem [shape: f32[1,8], index: 5, kind: input, shape index: {}]   ;;  %s1055_s6 = inlined_call_operand.vmem [shape: f32[2,256,4], index: 6, kind: output, shape index: {}]  }
   0x1 LB: > { %s749_s22 = sadd.s32 4294967295, %s805_s21   ;;  %p753_p0 = scmp.ge.s32.totalorder %s805_s21, 1  ;;  %s805_s21 = sphi %s845_s21, %s16_s21  }
   0x2   : > { %p222_p1 = scmp.lt.s32.totalorder %s805_s21, 3 }
   0x4   : > { %p223_p2 = pnand %p753_p0, %p222_p1 }
   0x5   : > { %v376_v0 = vld [vmem:[%s1051_s2] sm:$0xf] (!%p223_p2)  ;;  %vm381_vm0 = vcmask (!%p223_p2), 1043456   ;;  %p257_p3 = scmp.lt.s32.totalorder (!%p223_p2), %s749_s22, 1  ;;  %v807_v1 = vmov (!%p223_p2), 0.0   ;;  %vm808_vm1 = vmmov (!%p223_p2), 0  }
   0x6   : > { %226 = sbr.rel (%p223_p2) target bundleno = 660 (0x294), region = 44  ;;  %774 = vmatprep.subr.mxu0 (!%p223_p2), %v807_v1  ;;  %776 = vmatprep.mubr.msk.f32.mxu0 (!%p223_p2), %vm808_vm1, %v807_v1  ;;  %vm304_vm2 = vcmask (!%p223_p2), 31744   ;;  %vm462_vm3 = vcmask (!%p223_p2), 1041408   ;;  %vm458_vm4 = vcmask (!%p223_p2), 15360   ;;  %s809_s11 = smov (!%p223_p2), 124  }
   0x7   : > { %775 = vmatpush3.msk.msra.mxu0 (!%p223_p2), %vm381_vm0, %v376_v0  ;;  %779 = vmatprep.subr.mxu1 (!%p223_p2), %v807_v1 }
   0x8   : > { %781 = vmatprep.mubr.msk.f32.mxu1 (!%p223_p2), %vm808_vm1, %v807_v1 }
   0xd   : > { %s1057_s22 = smov (!%p257_p3, %s749_s22), 1 }
   0xe   : > { %s856_s25 = sshll.u32 %s1057_s22, 8 }
   0xf   : > { %s862_s28 = scalar_lea.vmem %s1049_s0, %s856_s25  ;;  %s942_s14 = scalar_lea.vmem %s1050_s1, %s856_s25 }
  0x10   : > { %v272_v2 = vld [vmem:[%s862_s28] sm:$0xff]  ;;  %v273_v3 = vld [vmem:[%s862_s28 + $0x8] sm:$0xff]  ;;  %v274_v4 = vld [vmem:[%s862_s28 + $0x10] sm:$0xff]  ;;  %s980_s17 = scalar_lea.vmem %s1055_s6, %s856_s25 }
  0x11   : > { %v275_v5 = vld [vmem:[%s862_s28 + $0x18] sm:$0xff]  ;;  %v305_v6 = vsel %vm304_vm2, %v272_v2, 0.0  ;;  %v306_v7 = vsel %vm304_vm2, %v273_v3, 0.0  ;;  %v308_v8 = vsel %vm304_vm2, %v274_v4, 0.0  ;;  %v276_v9 = vld [vmem:[%s862_s28 + $0x20] sm:$0xff]  ;;  %v277_v12 = vld [vmem:[%s862_s28 + $0x28] sm:$0xff] }
  0x12   : > { %v307_v10 = vadd.f32 %v306_v7, %v305_v6  ;;  %v310_v11 = vsel %vm304_vm2, %v275_v5, 0.0  ;;  %v312_v14 = vsel %vm304_vm2, %v276_v9, 0.0  ;;  %v278_v15 = vld [vmem:[%s862_s28 + $0x30] sm:$0xff]  ;;  %v314_v17 = vsel %vm304_vm2, %v277_v12, 0.0  ;;  %v279_v18 = vld [vmem:[%s862_s28 + $0x38] sm:$0xff]  ;;  %v280_v21 = vld [vmem:[%s862_s28 + $0x40] sm:$0xff] }
  0x13   : > { %v316_v20 = vsel %vm304_vm2, %v278_v15, 0.0  ;;  %v318_v23 = vsel %vm304_vm2, %v279_v18, 0.0  ;;  %v281_v24 = vld [vmem:[%s862_s28 + $0x48] sm:$0xff]  ;;  %v320_v26 = vsel %vm304_vm2, %v280_v21, 0.0  ;;  %v282_v27 = vld [vmem:[%s862_s28 + $0x50] sm:$0xff]  ;;  %v283_v30 = vld [vmem:[%s862_s28 + $0x58] sm:$0xff] }
  0x14   : > { %v309_v13 = vadd.f32 %v308_v8, %v307_v10  ;;  %v322_v29 = vsel %vm304_vm2, %v281_v24, 0.0  ;;  %v324_v32 = vsel %vm304_vm2, %v282_v27, 0.0  ;;  %v284_v33 = vld [vmem:[%s862_s28 + $0x60] sm:$0xff]  ;;  %v326_v35 = vsel %vm304_vm2, %v283_v30, 0.0  ;;  %v285_v36 = vld [vmem:[%s862_s28 + $0x68] sm:$0xff]  ;;  %v286_v39 = vld [vmem:[%s862_s28 + $0x70] sm:$0xff] }
  0x15   : > { %v328_v38 = vsel %vm304_vm2, %v284_v33, 0.0  ;;  %v330_v41 = vsel %vm304_vm2, %v285_v36, 0.0  ;;  %v287_v42 = vld [vmem:[%s862_s28 + $0x78] sm:$0xff]  ;;  %v332_v44 = vsel %vm304_vm2, %v286_v39, 0.0  ;;  %v288_v45 = vld [vmem:[%s862_s28 + $0x80] sm:$0xff]  ;;  %v289_v48 = vld [vmem:[%s862_s28 + $0x88] sm:$0xff] }
  0x16   : > { %v311_v16 = vadd.f32 %v310_v11, %v309_v13  ;;  %v334_v47 = vsel %vm304_vm2, %v287_v42, 0.0  ;;  %v336_v50 = vsel %vm304_vm2, %v288_v45, 0.0  ;;  %v290_v51 = vld [vmem:[%s862_s28 + $0x90] sm:$0xff]  ;;  %v338_v53 = vsel %vm304_vm2, %v289_v48, 0.0  ;;  %v291_v54 = vld [vmem:[%s862_s28 + $0x98] sm:$0xff]  ;;  %v292_v57 = vld [vmem:[%s862_s28 + $0xa0] sm:$0xff] }
  0x17   : > { %v340_v56 = vsel %vm304_vm2, %v290_v51, 0.0  ;;  %v342_v59 = vsel %vm304_vm2, %v291_v54, 0.0  ;;  %v293_v60 = vld [vmem:[%s862_s28 + $0xa8] sm:$0xff]  ;;  %v344_v62 = vsel %vm304_vm2, %v292_v57, 0.0  ;;  %v294_v63 = vld [vmem:[%s862_s28 + $0xb0] sm:$0xff]  ;;  %v295_v2 = vld [vmem:[%s862_s28 + $0xb8] sm:$0xff] }
  0x18   : > { %v313_v19 = vadd.f32 %v312_v14, %v311_v16  ;;  %v346_v1 = vsel %vm304_vm2, %v293_v60, 0.0  ;;  %v348_v4 = vsel %vm304_vm2, %v294_v63, 0.0  ;;  %v296_v5 = vld [vmem:[%s862_s28 + $0xc0] sm:$0xff]  ;;  %v350_v7 = vsel %vm304_vm2, %v295_v2, 0.0  ;;  %v297_v8 = vld [vmem:[%s862_s28 + $0xc8] sm:$0xff]  ;;  %v298_v11 = vld [vmem:[%s862_s28 + $0xd0] sm:$0xff] }
  0x19   : > { %v352_v10 = vsel %vm304_vm2, %v296_v5, 0.0  ;;  %v354_v13 = vsel %vm304_vm2, %v297_v8, 0.0  ;;  %v299_v14 = vld [vmem:[%s862_s28 + $0xd8] sm:$0xff]  ;;  %v356_v16 = vsel %vm304_vm2, %v298_v11, 0.0  ;;  %v457_v48 = vld [vmem:[%s1054_s5] sm:$0x1] }
  0x1a   : > { %v315_v22 = vadd.f32 %v314_v17, %v313_v19  ;;  %v300_v17 = vld [vmem:[%s862_s28 + $0xe0] sm:$0xff]  ;;  %v358_v19 = vsel %vm304_vm2, %v299_v14, 0.0  ;;  %v545_v60 = vld [vmem:[%s942_s14 + $0x18] sm:$0xff]  ;;  %v548_v63 = vld [vmem:[%s942_s14 + $0x30] sm:$0xff] }
  0x1b   : > { %v542_v57 = vld [vmem:[%s942_s14] sm:$0xff]  ;;  %v555_v8 = vld [vmem:[%s942_s14 + $0x68] sm:$0xff]  ;;  %v561_v14 = vld [vmem:[%s942_s14 + $0x98] sm:$0xff] }
  0x1c   : > { %v317_v25 = vadd.f32 %v316_v20, %v315_v22  ;;  %v301_v20 = vld [vmem:[%s862_s28 + $0xe8] sm:$0xff]  ;;  %v360_v22 = vsel %vm304_vm2, %v300_v17, 0.0  ;;  %v550_v2 = vld [vmem:[%s942_s14 + $0x40] sm:$0xff] }
  0x1d   : > { %v558_v11 = vld [vmem:[%s942_s14 + $0x80] sm:$0xff] }
  0x1e   : > { %v319_v28 = vadd.f32 %v318_v23, %v317_v25  ;;  %v302_v23 = vld [vmem:[%s862_s28 + $0xf0] sm:$0xff]  ;;  %v362_v25 = vsel %vm304_vm2, %v301_v20, 0.0  ;;  %v563_v20 = vld [vmem:[%s942_s14 + $0xa8] sm:$0xff] }
  0x20   : > { %v321_v31 = vadd.f32 %v320_v26, %v319_v28  ;;  %v303_v26 = vld [vmem:[%s862_s28 + $0xf8] sm:$0xff]  ;;  %v364_v28 = vsel %vm304_vm2, %v302_v23, 0.0 }
  0x21   : > { %v366_v30 = vsel %vm304_vm2, %v303_v26, 0.0  ;;  %v565_v26 = vld [vmem:[%s942_s14 + $0xb8] sm:$0xff] }
  0x22   : > { %v323_v34 = vadd.f32 %v322_v29, %v321_v31 }
  0x24   : > { %v325_v37 = vadd.f32 %v324_v32, %v323_v34 }
  0x26   : > { %v327_v40 = vadd.f32 %v326_v35, %v325_v37 }
  0x28   : > { %v329_v43 = vadd.f32 %v328_v38, %v327_v40  ;;  %v456_v40 = vld [vmem:[%s1053_s4] sm:$0x3] }
  0x29   : > { %780 = vmatpush3.msk.msra.mxu1 %vm462_vm3, %v456_v40  ;;  %v571_v40 = vld [vmem:[%s942_s14 + $0xe8] sm:$0xff] }
  0x2a   : > { %v331_v46 = vadd.f32 %v330_v41, %v329_v43  ;;  %v377_v41 = vld [vmem:[%s1052_s3] sm:$0x1] }
  0x2c   : > { %v333_v49 = vadd.f32 %v332_v44, %v331_v46  ;;  %v574_v46 = vlaneseq }
  0x2e   : > { %v335_v52 = vadd.f32 %v334_v47, %v333_v49  ;;  %v575_v47 = vshrl.u32 %v574_v46, 7 }
  0x30   : > { %v337_v55 = vadd.f32 %v336_v50, %v335_v52  ;;  %v576_v49 = vsub.s32 0, %v575_v47 }
  0x32   : > { %v339_v58 = vadd.f32 %v338_v53, %v337_v55 }
  0x34   : > { %v341_v61 = vadd.f32 %v340_v56, %v339_v58  ;;  %v543_v58 = vld [vmem:[%s942_s14 + $0x8] sm:$0xff] }
  0x36   : > { %v343_v0 = vadd.f32 %v342_v59, %v341_v61  ;;  %v544_v59 = vld [vmem:[%s942_s14 + $0x10] sm:$0xff]  ;;  %v546_v61 = vld [vmem:[%s942_s14 + $0x20] sm:$0xff] }
  0x38   : > { %v345_v3 = vadd.f32 %v344_v62, %v343_v0  ;;  %v547_v62 = vld [vmem:[%s942_s14 + $0x28] sm:$0xff]  ;;  %v549_v0 = vld [vmem:[%s942_s14 + $0x38] sm:$0xff] }
  0x3a   : > { %v347_v6 = vadd.f32 %v346_v1, %v345_v3  ;;  %v551_v3 = vld [vmem:[%s942_s14 + $0x48] sm:$0xff] }
  0x3c   : > { %v349_v9 = vadd.f32 %v348_v4, %v347_v6  ;;  %v552_v4 = vld [vmem:[%s942_s14 + $0x50] sm:$0xff]  ;;  %v553_v6 = vld [vmem:[%s942_s14 + $0x58] sm:$0xff] }
  0x3e   : > { %v351_v12 = vadd.f32 %v350_v7, %v349_v9  ;;  %v554_v7 = vld [vmem:[%s942_s14 + $0x60] sm:$0xff]  ;;  %v556_v9 = vld [vmem:[%s942_s14 + $0x70] sm:$0xff] }
  0x40   : > { %v353_v15 = vadd.f32 %v352_v10, %v351_v12  ;;  %v557_v10 = vld [vmem:[%s942_s14 + $0x78] sm:$0xff]  ;;  %v559_v12 = vld [vmem:[%s942_s14 + $0x88] sm:$0xff] }
  0x42   : > { %v355_v18 = vadd.f32 %v354_v13, %v353_v15  ;;  %v560_v13 = vld [vmem:[%s942_s14 + $0x90] sm:$0xff] }
  0x44   : > { %v357_v21 = vadd.f32 %v356_v16, %v355_v18 }
  0x46   : > { %v359_v24 = vadd.f32 %v358_v19, %v357_v21  ;;  %v562_v19 = vld [vmem:[%s942_s14 + $0xa0] sm:$0xff]  ;;  %v564_v21 = vld [vmem:[%s942_s14 + $0xb0] sm:$0xff] }
  0x48   : > { %v361_v27 = vadd.f32 %v360_v22, %v359_v24 }
  0x4a   : > { %v363_v29 = vadd.f32 %v362_v25, %v361_v27  ;;  %v566_v27 = vld [vmem:[%s942_s14 + $0xc0] sm:$0xff] }
  0x4c   : > { %v365_v31 = vadd.f32 %v364_v28, %v363_v29  ;;  %v567_v28 = vld [vmem:[%s942_s14 + $0xc8] sm:$0xff] }
  0x4e   : > { %v367_v32 = vadd.f32 %v366_v30, %v365_v31 }
  0x50   : > { %v368_v33 = vrot.slane %v367_v32, 4 }
  0x52   : > { %v369_v34 = vadd.f32 %v368_v33, %v367_v32  ;;  %v568_v33 = vld [vmem:[%s942_s14 + $0xd0] sm:$0xff] }
  0x54   : > { %v370_v35 = vrot.slane %v369_v34, 2 }
  0x56   : > { %v371_v36 = vadd.f32 %v370_v35, %v369_v34  ;;  %v569_v34 = vld [vmem:[%s942_s14 + $0xd8] sm:$0xff]  ;;  %v570_v35 = vld [vmem:[%s942_s14 + $0xe0] sm:$0xff] }
  0x58   : > { %v372_v37 = vrot.slane %v371_v36, 1 }
  0x5a   : > { %v373_v38 = vadd.f32 %v372_v37, %v371_v36 }
  0x5c   : > { %v375_v39 = vmul.f32 0.00390625, %v373_v38 }
  0x5e   : > { %777 = vmatmul.mubr.msk.f32.vlgmr.msra.gmra.mrb[0].mxu0 %vm304_vm2, %v375_v39 }
 0x131   : > { %v451_v42 = vpop.f32.mrb[0].mxu0 }
 0x132   : > { %v452_v43 = vadd.f32 %v451_v42, %v377_v41  ;;  %v778_v44 = vpop.f32.mrb[1].mxu0  ;;  %v572_v41 = vld [vmem:[%s942_s14 + $0xf0] sm:$0xff]  ;;  %v573_v42 = vld [vmem:[%s942_s14 + $0xf8] sm:$0xff] }
 0x134   : > { %v455_v45 = vmax.f32 %v452_v43, 0.0 }
 0x136   : > { %782 = vmatmul.mubr.msk.f32.vlgmr.msra.gmra.mrb[0].mxu1 %vm458_vm4, %v455_v45 }
 0x209   : > { %v532_v50 = vpop.f32.mrb[0].mxu1 }
 0x20a   : > { %v533_v51 = vadd.f32 %v532_v50, %v457_v48  ;;  %v783_v52 = vpop.f32.mrb[1].mxu1 }
 0x20c   : > { %v764_v53 = vmul.f32 -1.442695, %v533_v51  ;;  %v613_v54 = vrot.slane %v533_v51, %v576_v49 }
 0x20e   : > { %795 = vpow2.f32 %v764_v53  ;;  %615 = vrot.lane.b32.xlu0 %v613_v54, %s809_s11 }
 0x218   : > { %v796_v55 = vpop.eup %795 }
 0x219   : > { %v539_v56 = vadd.f32 1.0, %v796_v55 }
 0x21b   : > { %797 = vrcp.f32 %v539_v56 }
 0x225   : > { %v798_v1 = vpop.eup %797 }
 0x226   : > { %v577_v5 = vrot.slane %v798_v1, %v576_v49 }
 0x228   : > { %v578_v15 = vmul.f32 %v577_v5, %v542_v57  ;;  %v579_v16 = vmul.f32 %v577_v5, %v543_v58  ;;  %v580_v17 = vmul.f32 %v577_v5, %v544_v59  ;;  %v581_v18 = vmul.f32 %v577_v5, %v545_v60 }
 0x229   : > { %v582_v22 = vmul.f32 %v577_v5, %v546_v61  ;;  %v583_v23 = vmul.f32 %v577_v5, %v547_v62  ;;  %v584_v24 = vmul.f32 %v577_v5, %v548_v63  ;;  %v585_v25 = vmul.f32 %v577_v5, %v549_v0 }
 0x22a   : > { %v586_v29 = vmul.f32 %v577_v5, %v550_v2  ;;  %v587_v30 = vmul.f32 %v577_v5, %v551_v3  ;;  %v588_v31 = vmul.f32 %v577_v5, %v552_v4  ;;  %v589_v32 = vmul.f32 %v577_v5, %v553_v6 }
 0x22b   : > { %v590_v36 = vmul.f32 %v577_v5, %v554_v7  ;;  %v591_v37 = vmul.f32 %v577_v5, %v555_v8  ;;  %v592_v38 = vmul.f32 %v577_v5, %v556_v9  ;;  %v593_v39 = vmul.f32 %v577_v5, %v557_v10 }
 0x22c   : > { %v594_v43 = vmul.f32 %v577_v5, %v558_v11  ;;  %v595_v44 = vmul.f32 %v577_v5, %v559_v12  ;;  %v596_v45 = vmul.f32 %v577_v5, %v560_v13  ;;  %v597_v46 = vmul.f32 %v577_v5, %v561_v14 }
 0x22d   : > { %v598_v47 = vmul.f32 %v577_v5, %v562_v19  ;;  %v599_v48 = vmul.f32 %v577_v5, %v563_v20  ;;  %v600_v49 = vmul.f32 %v577_v5, %v564_v21  ;;  %v601_v50 = vmul.f32 %v577_v5, %v565_v26 }
 0x22e   : > { %v602_v51 = vmul.f32 %v577_v5, %v566_v27  ;;  %v603_v52 = vmul.f32 %v577_v5, %v567_v28  ;;  %v604_v53 = vmul.f32 %v577_v5, %v568_v33  ;;  %v605_v54 = vmul.f32 %v577_v5, %v569_v34 }
 0x22f   : > { %v606_v55 = vmul.f32 %v577_v5, %v570_v35  ;;  %v607_v56 = vmul.f32 %v577_v5, %v571_v40  ;;  %v608_v57 = vmul.f32 %v577_v5, %v572_v41  ;;  %v609_v58 = vmul.f32 %v577_v5, %v573_v42 }
 0x280   : > { %v616_v59 = vpop.permute.xlu0 %615 }
 0x281   : > { %v618_v60 = vadd.f32 %v616_v59, %v578_v15  ;;  %v619_v61 = vadd.f32 %v616_v59, %v579_v16  ;;  %v620_v62 = vadd.f32 %v616_v59, %v580_v17  ;;  %v621_v63 = vadd.f32 %v616_v59, %v581_v18 }
 0x282   : > { %v622_v0 = vadd.f32 %v616_v59, %v582_v22  ;;  %v623_v1 = vadd.f32 %v616_v59, %v583_v23  ;;  %v624_v2 = vadd.f32 %v616_v59, %v584_v24  ;;  %v625_v3 = vadd.f32 %v616_v59, %v585_v25 }
 0x283   : > { %v626_v4 = vadd.f32 %v616_v59, %v586_v29  ;;  %v627_v5 = vadd.f32 %v616_v59, %v587_v30  ;;  %v628_v6 = vadd.f32 %v616_v59, %v588_v31  ;;  %v629_v7 = vadd.f32 %v616_v59, %v589_v32  ;;  %650 = vst.msk [vmem:[%s980_s17] sm:$0xff] %vm304_vm2, %v618_v60 }
 0x284   : > { %651 = vst.msk [vmem:[%s980_s17 + $0x8] sm:$0xff] %vm304_vm2, %v619_v61  ;;  %652 = vst.msk [vmem:[%s980_s17 + $0x10] sm:$0xff] %vm304_vm2, %v620_v62  ;;  %v630_v8 = vadd.f32 %v616_v59, %v590_v36  ;;  %v631_v9 = vadd.f32 %v616_v59, %v591_v37  ;;  %v632_v10 = vadd.f32 %v616_v59, %v592_v38 }
 0x285   : > { %653 = vst.msk [vmem:[%s980_s17 + $0x18] sm:$0xff] %vm304_vm2, %v621_v63  ;;  %v633_v11 = vadd.f32 %v616_v59, %v593_v39  ;;  %654 = vst.msk [vmem:[%s980_s17 + $0x20] sm:$0xff] %vm304_vm2, %v622_v0  ;;  %v634_v12 = vadd.f32 %v616_v59, %v594_v43  ;;  %v635_v13 = vadd.f32 %v616_v59, %v595_v44 }
 0x286   : > { %655 = vst.msk [vmem:[%s980_s17 + $0x28] sm:$0xff] %vm304_vm2, %v623_v1  ;;  %656 = vst.msk [vmem:[%s980_s17 + $0x30] sm:$0xff] %vm304_vm2, %v624_v2  ;;  %v636_v14 = vadd.f32 %v616_v59, %v596_v45  ;;  %v637_v15 = vadd.f32 %v616_v59, %v597_v46  ;;  %v638_v16 = vadd.f32 %v616_v59, %v598_v47 }
 0x287   : > { %657 = vst.msk [vmem:[%s980_s17 + $0x38] sm:$0xff] %vm304_vm2, %v625_v3  ;;  %658 = vst.msk [vmem:[%s980_s17 + $0x40] sm:$0xff] %vm304_vm2, %v626_v4  ;;  %v639_v17 = vadd.f32 %v616_v59, %v599_v48  ;;  %v640_v18 = vadd.f32 %v616_v59, %v600_v49  ;;  %v641_v19 = vadd.f32 %v616_v59, %v601_v50 }
 0x288   : > { %659 = vst.msk [vmem:[%s980_s17 + $0x48] sm:$0xff] %vm304_vm2, %v627_v5  ;;  %660 = vst.msk [vmem:[%s980_s17 + $0x50] sm:$0xff] %vm304_vm2, %v628_v6  ;;  %v642_v20 = vadd.f32 %v616_v59, %v602_v51  ;;  %v643_v21 = vadd.f32 %v616_v59, %v603_v52  ;;  %v644_v22 = vadd.f32 %v616_v59, %v604_v53 }
 0x289   : > { %661 = vst.msk [vmem:[%s980_s17 + $0x58] sm:$0xff] %vm304_vm2, %v629_v7  ;;  %662 = vst.msk [vmem:[%s980_s17 + $0x60] sm:$0xff] %vm304_vm2, %v630_v8  ;;  %v645_v23 = vadd.f32 %v616_v59, %v605_v54  ;;  %v646_v24 = vadd.f32 %v616_v59, %v606_v55  ;;  %v647_v25 = vadd.f32 %v616_v59, %v607_v56 }
 0x28a   : > { %663 = vst.msk [vmem:[%s980_s17 + $0x68] sm:$0xff] %vm304_vm2, %v631_v9  ;;  %664 = vst.msk [vmem:[%s980_s17 + $0x70] sm:$0xff] %vm304_vm2, %v632_v10  ;;  %v648_v26 = vadd.f32 %v616_v59, %v608_v57  ;;  %v649_v27 = vadd.f32 %v616_v59, %v609_v58 }
 0x28b   : > { %665 = vst.msk [vmem:[%s980_s17 + $0x78] sm:$0xff] %vm304_vm2, %v633_v11  ;;  %666 = vst.msk [vmem:[%s980_s17 + $0x80] sm:$0xff] %vm304_vm2, %v634_v12 }
 0x28c   : > { %667 = vst.msk [vmem:[%s980_s17 + $0x88] sm:$0xff] %vm304_vm2, %v635_v13  ;;  %668 = vst.msk [vmem:[%s980_s17 + $0x90] sm:$0xff] %vm304_vm2, %v636_v14 }
 0x28d   : > { %669 = vst.msk [vmem:[%s980_s17 + $0x98] sm:$0xff] %vm304_vm2, %v637_v15  ;;  %670 = vst.msk [vmem:[%s980_s17 + $0xa0] sm:$0xff] %vm304_vm2, %v638_v16 }
 0x28e   : > { %671 = vst.msk [vmem:[%s980_s17 + $0xa8] sm:$0xff] %vm304_vm2, %v639_v17  ;;  %672 = vst.msk [vmem:[%s980_s17 + $0xb0] sm:$0xff] %vm304_vm2, %v640_v18 }
 0x28f   : > { %673 = vst.msk [vmem:[%s980_s17 + $0xb8] sm:$0xff] %vm304_vm2, %v641_v19  ;;  %674 = vst.msk [vmem:[%s980_s17 + $0xc0] sm:$0xff] %vm304_vm2, %v642_v20 }
 0x290   : > { %675 = vst.msk [vmem:[%s980_s17 + $0xc8] sm:$0xff] %vm304_vm2, %v643_v21  ;;  %676 = vst.msk [vmem:[%s980_s17 + $0xd0] sm:$0xff] %vm304_vm2, %v644_v22 }
 0x291   : > { %677 = vst.msk [vmem:[%s980_s17 + $0xd8] sm:$0xff] %vm304_vm2, %v645_v23  ;;  %678 = vst.msk [vmem:[%s980_s17 + $0xe0] sm:$0xff] %vm304_vm2, %v646_v24 }
 0x292   : > { %679 = vst.msk [vmem:[%s980_s17 + $0xe8] sm:$0xff] %vm304_vm2, %v647_v25  ;;  %680 = vst.msk [vmem:[%s980_s17 + $0xf0] sm:$0xff] %vm304_vm2, %v648_v26 }
 0x293   : > { %681 = vst.msk [vmem:[%s980_s17 + $0xf8] sm:$0xff] %vm304_vm2, %v649_v27 }
 0x294 PF: > { %s16_s21 = sadd.s32 1, %s805_s21  }
 0x295   : > { %p13_p4 = scmp.ge.s32.totalorder %s16_s21, 4  }
 0x297   :  { %15 = sbr.rel (!%p13_p4) target bundleno = 1 (0x1), region = 77 }

</bundles_post_ra>
